<compile_context>
chip_gen: v5e
topology: v5e:2x2
jax: 0.10.0
libtpu: 0.0.40
codegen_flags: <defaults>
</compile_context>

<pallas_src>
import functools

import jax
import jax.numpy as jnp
from jax.experimental import pallas as pl
from jax.experimental.pallas import tpu as pltpu


# --------------------------------------------------------------------------- #
# Kernels
# --------------------------------------------------------------------------- #
def _downsample_conv_kernel(xm_ref, xh_ref, wcr_ref, wl_ref, b_ref, o_ref):
    """Stride-2 3x3 conv (padding=1) on a column-pair-packed NHWC row block.

    xm_ref  : (2*hb, Wo, 2C)  input rows [2*r*hb, 2*(r+1)*hb); lanes pack
              (even col | odd col) channel pairs.
    xh_ref  : (1, Wo, 2C)     halo row 2*r*hb - 1 (clamped; zeroed here when r==0).
    wcr_ref : (3, 2C, Cout)   centre+right column taps for ky = 0,1,2.
    wl_ref  : (3, C, Cout)    left column taps for ky = 0,1,2.
    b_ref   : (1, Cout)       bias (f32).
    o_ref   : (hb, Wo, Cout)
    """
    hb2, wo, c2 = xm_ref.shape
    hb, c = hb2 // 2, c2 // 2
    cout = o_ref.shape[-1]

    # Load once; zero the halo row on the first row block (the conv's top pad).
    xm = xm_ref[...].astype(jnp.float32)
    keep = (pl.program_id(0) > 0).astype(jnp.float32)
    xh = xh_ref[...].astype(jnp.float32) * keep

    # Row-parity split: leading-dim reshape + static index -> no lane/sublane relayout.
    x4 = xm.reshape(hb, 2, wo, c2)
    x_mid3 = x4[:, 0]                     # input rows 2i       (ky = 1)
    x_bot3 = x4[:, 1]                     # input rows 2i + 1   (ky = 2)
    if hb > 1:
        x_top3 = jnp.concatenate([xh, x_bot3[:hb - 1]], axis=0)   # rows 2i - 1 (ky = 0)
    else:
        x_top3 = xh

    # One tile-aligned collapse per row group (f32, aligned when Wo % 8 == 0),
    # then cast to bf16 for the MXU.  Not a per-tap misaligned slice+reshape.
    x_top = x_top3.reshape(hb * wo, c2).astype(jnp.bfloat16)
    x_mid = x_mid3.reshape(hb * wo, c2).astype(jnp.bfloat16)
    x_bot = x_bot3.reshape(hb * wo, c2).astype(jnp.bfloat16)

    def dot32(a, w):
        return jnp.dot(a, w, preferred_element_type=jnp.float32)

    # Centre + right column taps: K = 2C dots (two taps fused per dot), f32 accum.
    acc = dot32(x_top, wcr_ref[0]) + dot32(x_mid, wcr_ref[1]) + dot32(x_bot, wcr_ref[2])

    # Left column taps: evaluated at packed column j (odd channel half), they
    # contribute to output column j + 1 -> single shift-add on the small output.
    tl = (dot32(x_top[:, c:], wl_ref[0])
          + dot32(x_mid[:, c:], wl_ref[1])
          + dot32(x_bot[:, c:], wl_ref[2]))

    acc = acc.reshape(hb, wo, cout)
    if wo > 1:
        tl = tl.reshape(hb, wo, cout)
        zero_col = jnp.zeros((hb, 1, cout), jnp.float32)
        acc = acc + jnp.concatenate([zero_col, tl[:, :wo - 1, :]], axis=1)
    # wo == 1: output column 0 only sees the zero pad on its left -> nothing to add.

    o_ref[...] = (acc + b_ref[...]).astype(o_ref.dtype)


def _downsample_pool_kernel(x_ref, o_ref):
    """2x2 / stride-2 average pool on a column-pair-packed NHWC row block.

    x_ref : (2*hb, Wo, 2C)   raw input rows (free reshape view; no packing pass)
    o_ref : (hb, Wo, C)
    """
    hb2, wo, c2 = x_ref.shape
    hb, c = hb2 // 2, c2 // 2
    x = x_ref[...].astype(jnp.float32)
    x4 = x.reshape(hb, 2, wo, c2)
    xe, xo = x4[:, 0], x4[:, 1]
    out = 0.25 * (xe[..., :c] + xe[..., c:] + xo[..., :c] + xo[..., c:])
    o_ref[...] = out.astype(o_ref.dtype)


# --------------------------------------------------------------------------- #
# Parameter packing (tiny, done once outside the kernel)
# --------------------------------------------------------------------------- #
def pack_conv_weights(w_oihw):
    """[Cout, Cin, 3, 3] OIHW -> (wcr [3, 2*Cin, Cout], wl [3, Cin, Cout]).

    wcr[ky] stacks the centre (kx=1) tap on channels [0:Cin] and the right (kx=2)
    tap on [Cin:2Cin], matching the (even col | odd col) lane packing.
    wl[ky] is the left (kx=0) tap, applied to the odd-column half with a +1
    output-column shift inside the kernel.
    """
    cout, cin, kh, kw = w_oihw.shape
    assert kh == 3 and kw == 3
    w_hwio = jnp.transpose(w_oihw, (2, 3, 1, 0))                   # [ky, kx, Cin, Cout]
    wcr = jnp.concatenate([w_hwio[:, 1], w_hwio[:, 2]], axis=1)    # centre | right
    wl = w_hwio[:, 0]                                              # left
    return wcr, wl


# --------------------------------------------------------------------------- #
# Row-block selection (divisor of Ho, VMEM-budget capped, >= 2 blocks if possible)
# --------------------------------------------------------------------------- #
def _choose_row_block(ho, wo, c2, itemsize, target):
    bytes_per_out_row = 2 * wo * c2 * itemsize          # two input rows per output row
    cap_rows = max(1, (6 * 1024 * 1024) // max(bytes_per_out_row, 1))
    cap = max(1, min(target, cap_rows))
    if ho >= 2:
        cap = min(cap, max(1, ho // 2))                 # >= 2 row blocks -> megacore work
    b = max(1, min(cap, ho))
    while ho % b:
        b -= 1
    return b


# --------------------------------------------------------------------------- #
# Wrapper
# --------------------------------------------------------------------------- #
@functools.partial(jax.jit, static_argnames=("use_conv", "row_block"))
def downsample_pallas(x_nhwc, params, *, use_conv, row_block=32):
    n, h, w, c = x_nhwc.shape
    assert h % 2 == 0 and w % 2 == 0, "Downsample kernel expects even H, W"
    ho, wo = h // 2, w // 2
    c2 = 2 * c
    in_bytes = x_nhwc.dtype.itemsize
    hb = _choose_row_block(ho, wo, c2, in_bytes, row_block)
    n_rb = ho // hb

    # Free (metadata-only) reshape: adjacent column pairs land on the lane dim.
    x_pk = x_nhwc.reshape(n, h, wo, c2)

    grid = (n_rb, n)                       # row blocks first: shards across TCs even for N=1
    cparams = pltpu.CompilerParams(
        dimension_semantics=("parallel", "parallel"),
        vmem_limit_bytes=48 * 1024 * 1024,
    )

    if not use_conv:
        # Module semantics: avg-pool requires out_channels == channels.
        fn = pl.pallas_call(
            _downsample_pool_kernel,
            out_shape=jax.ShapeDtypeStruct((n, ho, wo, c), x_nhwc.dtype),
            grid=grid,
            in_specs=[pl.BlockSpec((None, 2 * hb, wo, c2), lambda r, i: (i, r, 0, 0))],
            out_specs=pl.BlockSpec((None, hb, wo, c), lambda r, i: (i, r, 0, 0)),
            compiler_params=cparams,
            cost_estimate=pl.CostEstimate(
                flops=4 * n * ho * wo * c,
                transcendentals=0,
                bytes_accessed=int(x_nhwc.size * in_bytes + n * ho * wo * c * in_bytes)),
        )
        return fn(x_pk)

    wcr = params["wcr"]                    # [3, 2C, Cout] bf16
    wl = params["wl"]                      # [3, C, Cout]  bf16
    bias = params["b"]                     # [1, Cout]     f32
    cout = wcr.shape[-1]

    # Halo row 2*r*hb - 1 (block size 1 -> block index == element row); clamped to 0
    # for r == 0 and zeroed inside the kernel (the conv's top zero pad).
    halo_map = lambda r, i: (i, jnp.maximum(2 * hb * r - 1, 0), 0, 0)

    fn = pl.pallas_call(
        _downsample_conv_kernel,
        out_shape=jax.ShapeDtypeStruct((n, ho, wo, cout), x_nhwc.dtype),
        grid=grid,
        in_specs=[
            pl.BlockSpec((None, 2 * hb, wo, c2), lambda r, i: (i, r, 0, 0)),
            pl.BlockSpec((None, 1, wo, c2), halo_map),
            pl.BlockSpec((3, c2, cout), lambda r, i: (0, 0, 0)),
            pl.BlockSpec((3, c, cout), lambda r, i: (0, 0, 0)),
            pl.BlockSpec((1, cout), lambda r, i: (0, 0)),
        ],
        out_specs=pl.BlockSpec((None, hb, wo, cout), lambda r, i: (i, r, 0, 0)),
        compiler_params=cparams,
        cost_estimate=pl.CostEstimate(
            flops=2 * n * ho * wo * 9 * c * cout,
            transcendentals=0,
            bytes_accessed=int(x_nhwc.size * in_bytes
                               + n * ho * wo * cout * in_bytes
                               + wcr.size * wcr.dtype.itemsize
                               + wl.size * wl.dtype.itemsize)),
    )
    return fn(x_pk, x_pk, wcr, wl, bias)


# --------------------------------------------------------------------------- #
# Plain-JAX reference (for validation)
# --------------------------------------------------------------------------- #
def downsample_ref(x_nhwc, w_oihw=None, b=None, *, use_conv):
    n, h, w, c = x_nhwc.shape
    if use_conv:
        w_hwio = jnp.transpose(w_oihw, (2, 3, 1, 0))
        y = jax.lax.conv_general_dilated(
            x_nhwc, w_hwio, window_strides=(2, 2), padding=((1, 1), (1, 1)),
            dimension_numbers=("NHWC", "HWIO", "NHWC"))
        return y + b
    return x_nhwc.reshape(n, h // 2, 2, w // 2, 2, c).mean(axis=(2, 4))


# --------------------------------------------------------------------------- #
if __name__ == "__main__":
    # Lane-dense channel count (C = 128) as in the diffusion-model usage of this block.
    N, C, H, W = 2, 128, 16, 16

    key = jax.random.PRNGKey(0)
    k0, k1, k2 = jax.random.split(key, 3)
    x_nchw = jax.random.normal(k0, (N, C, H, W), jnp.float32)          # PyTorch layout
    w = 0.05 * jax.random.normal(k1, (C, C, 3, 3), jnp.float32)        # OIHW, Cout=C
    b = 0.05 * jax.random.normal(k2, (C,), jnp.float32)

    # Kernel works in NHWC; convert from NCHW at the edges.
    x_nhwc = jnp.transpose(x_nchw, (0, 2, 3, 1))

    wcr, wl = pack_conv_weights(w)
    params = {
        "wcr": wcr.astype(jnp.bfloat16),
        "wl": wl.astype(jnp.bfloat16),
        "b": b.reshape(1, C).astype(jnp.float32),
    }

    # ---- use_conv=True path: 3x3 stride-2 conv ------------------------------
    out_conv = jax.block_until_ready(downsample_pallas(x_nhwc, params, use_conv=True))
    ref_conv = jax.block_until_ready(downsample_ref(x_nhwc, w, b, use_conv=True))
    assert out_conv.shape == (N, H // 2, W // 2, C)
    abs_err = float(jnp.max(jnp.abs(out_conv - ref_conv)))
    scale = float(jnp.max(jnp.abs(ref_conv))) + 1e-6
    assert abs_err / scale < 3e-2, f"conv mismatch: abs={abs_err}, rel={abs_err / scale}"

    # ---- use_conv=False path: 2x2 average pool ------------------------------
    out_pool = jax.block_until_ready(downsample_pallas(x_nhwc, None, use_conv=False))
    ref_pool = jax.block_until_ready(downsample_ref(x_nhwc, use_conv=False))
    assert out_pool.shape == (N, H // 2, W // 2, C)
    pool_err = float(jnp.max(jnp.abs(out_pool - ref_pool)))
    assert pool_err < 1e-5, f"pool mismatch: {pool_err}"

    print("KERNEL_OK")
</pallas_src>

<mosaic_0001>
module attributes {stable_mosaic.version = 11 : i64} {
  func.func @_downsample_conv_kernel(%arg0: i32, %arg1: i32, %arg2: memref<1x8x8x256xf32, #tpu.memory_space<vmem>>, %arg3: memref<1x1x8x256xf32, #tpu.memory_space<vmem>>, %arg4: memref<3x256x128xbf16, #tpu.memory_space<vmem>>, %arg5: memref<3x128x128xbf16, #tpu.memory_space<vmem>>, %arg6: memref<1x128xf32, #tpu.memory_space<vmem>>, %arg7: memref<1x4x8x128xf32, #tpu.memory_space<vmem>>) attributes {dimension_semantics = [#tpu.dimension_semantics<parallel>, #tpu.dimension_semantics<parallel>], iteration_bounds = array<i64: 2, 2>, scalar_prefetch = 0 : i64, scratch_operands = 0 : i64, tpu.core_type = #tpu.core_type<tc>, window_params = [{transform_indices = @transform_0, window_bounds = array<i64: 1, 8, 8, 256>}, {transform_indices = @transform_1, window_bounds = array<i64: 1, 1, 8, 256>}, {pipeline_mode = #tpu.pipeline_mode<synchronous>, transform_indices = @transform_2, window_bounds = array<i64: 3, 256, 128>}, {pipeline_mode = #tpu.pipeline_mode<synchronous>, transform_indices = @transform_3, window_bounds = array<i64: 3, 128, 128>}, {pipeline_mode = #tpu.pipeline_mode<synchronous>, transform_indices = @transform_4, window_bounds = array<i64: 1, 128>}, {transform_indices = @transform_5, window_bounds = array<i64: 1, 4, 8, 128>}]} {
    %c0 = arith.constant 0 : index
    %c0_0 = arith.constant 0 : index
    %c0_1 = arith.constant 0 : index
    %c0_2 = arith.constant 0 : index
    %0 = vector.load %arg2[%c0, %c0_0, %c0_1, %c0_2] : memref<1x8x8x256xf32, #tpu.memory_space<vmem>>, vector<1x8x8x256xf32>
    %1 = vector.shape_cast %0 : vector<1x8x8x256xf32> to vector<8x8x256xf32>
    %c0_i32 = arith.constant 0 : i32
    %2 = arith.cmpi sgt, %arg0, %c0_i32 : i32
    %3 = arith.extui %2 : i1 to i32
    %4 = arith.sitofp %3 : i32 to f32
    %c0_3 = arith.constant 0 : index
    %c0_4 = arith.constant 0 : index
    %c0_5 = arith.constant 0 : index
    %c0_6 = arith.constant 0 : index
    %5 = vector.load %arg3[%c0_3, %c0_4, %c0_5, %c0_6] : memref<1x1x8x256xf32, #tpu.memory_space<vmem>>, vector<1x1x8x256xf32>
    %6 = vector.shape_cast %5 : vector<1x1x8x256xf32> to vector<1x8x256xf32>
    %7 = vector.broadcast %4 : f32 to vector<1x8x256xf32>
    %8 = arith.mulf %6, %7 : vector<1x8x256xf32>
    %9 = vector.shape_cast %1 : vector<8x8x256xf32> to vector<4x2x8x256xf32>
    %10 = vector.extract_strided_slice %9 {offsets = [0, 0, 0, 0], sizes = [4, 1, 8, 256], strides = [1, 1, 1, 1]} : vector<4x2x8x256xf32> to vector<4x1x8x256xf32>
    %11 = vector.shape_cast %10 : vector<4x1x8x256xf32> to vector<4x8x256xf32>
    %12 = vector.extract_strided_slice %9 {offsets = [0, 1, 0, 0], sizes = [4, 1, 8, 256], strides = [1, 1, 1, 1]} : vector<4x2x8x256xf32> to vector<4x1x8x256xf32>
    %13 = vector.shape_cast %12 : vector<4x1x8x256xf32> to vector<4x8x256xf32>
    %14 = vector.extract_strided_slice %13 {offsets = [0, 0, 0], sizes = [3, 8, 256], strides = [1, 1, 1]} : vector<4x8x256xf32> to vector<3x8x256xf32>
    %15 = tpu.concatenate %8, %14 in 0 : vector<1x8x256xf32>, vector<3x8x256xf32> -> vector<4x8x256xf32>
    %16 = vector.shape_cast %15 : vector<4x8x256xf32> to vector<32x256xf32>
    %17 = arith.truncf %16 : vector<32x256xf32> to vector<32x256xbf16>
    %18 = vector.shape_cast %11 : vector<4x8x256xf32> to vector<32x256xf32>
    %19 = arith.truncf %18 : vector<32x256xf32> to vector<32x256xbf16>
    %20 = vector.shape_cast %13 : vector<4x8x256xf32> to vector<32x256xf32>
    %21 = arith.truncf %20 : vector<32x256xf32> to vector<32x256xbf16>
    %c0_7 = arith.constant 0 : index
    %c0_8 = arith.constant 0 : index
    %c0_9 = arith.constant 0 : index
    %22 = vector.load %arg4[%c0_7, %c0_8, %c0_9] : memref<3x256x128xbf16, #tpu.memory_space<vmem>>, vector<1x256x128xbf16>
    %23 = vector.shape_cast %22 : vector<1x256x128xbf16> to vector<256x128xbf16>
    %cst = arith.constant dense<0.000000e+00> : vector<32x128xf32>
    %24 = tpu.matmul %17, %23, %cst {dimension_numbers = #tpu.dot_dimension_numbers<[1], [0], [0], [1], [0, 0, 1, 1], [], []>} : vector<32x256xbf16>, vector<256x128xbf16>, vector<32x128xf32> -> vector<32x128xf32>
    %c1 = arith.constant 1 : index
    %c0_10 = arith.constant 0 : index
    %c0_11 = arith.constant 0 : index
    %25 = vector.load %arg4[%c1, %c0_10, %c0_11] : memref<3x256x128xbf16, #tpu.memory_space<vmem>>, vector<1x256x128xbf16>
    %26 = vector.shape_cast %25 : vector<1x256x128xbf16> to vector<256x128xbf16>
    %cst_12 = arith.constant dense<0.000000e+00> : vector<32x128xf32>
    %27 = tpu.matmul %19, %26, %cst_12 {dimension_numbers = #tpu.dot_dimension_numbers<[1], [0], [0], [1], [0, 0, 1, 1], [], []>} : vector<32x256xbf16>, vector<256x128xbf16>, vector<32x128xf32> -> vector<32x128xf32>
    %28 = arith.addf %24, %27 : vector<32x128xf32>
    %c2 = arith.constant 2 : index
    %c0_13 = arith.constant 0 : index
    %c0_14 = arith.constant 0 : index
    %29 = vector.load %arg4[%c2, %c0_13, %c0_14] : memref<3x256x128xbf16, #tpu.memory_space<vmem>>, vector<1x256x128xbf16>
    %30 = vector.shape_cast %29 : vector<1x256x128xbf16> to vector<256x128xbf16>
    %cst_15 = arith.constant dense<0.000000e+00> : vector<32x128xf32>
    %31 = tpu.matmul %21, %30, %cst_15 {dimension_numbers = #tpu.dot_dimension_numbers<[1], [0], [0], [1], [0, 0, 1, 1], [], []>} : vector<32x256xbf16>, vector<256x128xbf16>, vector<32x128xf32> -> vector<32x128xf32>
    %32 = arith.addf %28, %31 : vector<32x128xf32>
    %33 = vector.extract_strided_slice %17 {offsets = [0, 128], sizes = [32, 128], strides = [1, 1]} : vector<32x256xbf16> to vector<32x128xbf16>
    %c0_16 = arith.constant 0 : index
    %c0_17 = arith.constant 0 : index
    %c0_18 = arith.constant 0 : index
    %34 = vector.load %arg5[%c0_16, %c0_17, %c0_18] : memref<3x128x128xbf16, #tpu.memory_space<vmem>>, vector<1x128x128xbf16>
    %35 = vector.shape_cast %34 : vector<1x128x128xbf16> to vector<128x128xbf16>
    %cst_19 = arith.constant dense<0.000000e+00> : vector<32x128xf32>
    %36 = tpu.matmul %33, %35, %cst_19 {dimension_numbers = #tpu.dot_dimension_numbers<[1], [0], [0], [1], [0, 0, 1, 1], [], []>} : vector<32x128xbf16>, vector<128x128xbf16>, vector<32x128xf32> -> vector<32x128xf32>
    %37 = vector.extract_strided_slice %19 {offsets = [0, 128], sizes = [32, 128], strides = [1, 1]} : vector<32x256xbf16> to vector<32x128xbf16>
    %c1_20 = arith.constant 1 : index
    %c0_21 = arith.constant 0 : index
    %c0_22 = arith.constant 0 : index
    %38 = vector.load %arg5[%c1_20, %c0_21, %c0_22] : memref<3x128x128xbf16, #tpu.memory_space<vmem>>, vector<1x128x128xbf16>
    %39 = vector.shape_cast %38 : vector<1x128x128xbf16> to vector<128x128xbf16>
    %cst_23 = arith.constant dense<0.000000e+00> : vector<32x128xf32>
    %40 = tpu.matmul %37, %39, %cst_23 {dimension_numbers = #tpu.dot_dimension_numbers<[1], [0], [0], [1], [0, 0, 1, 1], [], []>} : vector<32x128xbf16>, vector<128x128xbf16>, vector<32x128xf32> -> vector<32x128xf32>
    %41 = arith.addf %36, %40 : vector<32x128xf32>
    %42 = vector.extract_strided_slice %21 {offsets = [0, 128], sizes = [32, 128], strides = [1, 1]} : vector<32x256xbf16> to vector<32x128xbf16>
    %c2_24 = arith.constant 2 : index
    %c0_25 = arith.constant 0 : index
    %c0_26 = arith.constant 0 : index
    %43 = vector.load %arg5[%c2_24, %c0_25, %c0_26] : memref<3x128x128xbf16, #tpu.memory_space<vmem>>, vector<1x128x128xbf16>
    %44 = vector.shape_cast %43 : vector<1x128x128xbf16> to vector<128x128xbf16>
    %cst_27 = arith.constant dense<0.000000e+00> : vector<32x128xf32>
    %45 = tpu.matmul %42, %44, %cst_27 {dimension_numbers = #tpu.dot_dimension_numbers<[1], [0], [0], [1], [0, 0, 1, 1], [], []>} : vector<32x128xbf16>, vector<128x128xbf16>, vector<32x128xf32> -> vector<32x128xf32>
    %46 = arith.addf %41, %45 : vector<32x128xf32>
    %47 = vector.shape_cast %32 : vector<32x128xf32> to vector<4x8x128xf32>
    %48 = vector.shape_cast %46 : vector<32x128xf32> to vector<4x8x128xf32>
    %cst_28 = arith.constant 0.000000e+00 : f32
    %49 = vector.broadcast %cst_28 : f32 to vector<4x1x128xf32>
    %50 = vector.extract_strided_slice %48 {offsets = [0, 0, 0], sizes = [4, 7, 128], strides = [1, 1, 1]} : vector<4x8x128xf32> to vector<4x7x128xf32>
    %51 = tpu.concatenate %49, %50 in 1 : vector<4x1x128xf32>, vector<4x7x128xf32> -> vector<4x8x128xf32>
    %52 = arith.addf %47, %51 : vector<4x8x128xf32>
    %c0_29 = arith.constant 0 : index
    %c0_30 = arith.constant 0 : index
    %53 = vector.load %arg6[%c0_29, %c0_30] : memref<1x128xf32, #tpu.memory_space<vmem>>, vector<1x128xf32>
    %54 = vector.shape_cast %53 : vector<1x128xf32> to vector<1x1x128xf32>
    %55 = vector.broadcast %54 : vector<1x1x128xf32> to vector<4x8x128xf32>
    %56 = arith.addf %52, %55 : vector<4x8x128xf32>
    %c0_31 = arith.constant 0 : index
    %c0_32 = arith.constant 0 : index
    %c0_33 = arith.constant 0 : index
    %c0_34 = arith.constant 0 : index
    %57 = vector.load %arg7[%c0_31, %c0_32, %c0_33, %c0_34] : memref<1x4x8x128xf32, #tpu.memory_space<vmem>>, vector<1x4x8x128xf32>
    %58 = vector.shape_cast %57 : vector<1x4x8x128xf32> to vector<4x8x128xf32>
    %59 = vector.shape_cast %56 : vector<4x8x128xf32> to vector<1x4x8x128xf32>
    tpu.vector_store %arg7[%c0_31, %c0_32, %c0_33, %c0_34], %59 {strides = array<i32>} : memref<1x4x8x128xf32, #tpu.memory_space<vmem>>, vector<1x4x8x128xf32>,
    return
  }
  func.func @transform_0(%arg0: i32, %arg1: i32) -> (i32, i32, i32, i32) {
    %c0_i32 = arith.constant 0 : i32
    %c0_i32_0 = arith.constant 0 : i32
    %c0_i32_1 = arith.constant 0 : i32
    return %arg1, %arg0, %c0_i32, %c0_i32_0 : i32, i32, i32, i32
  }
  func.func @transform_1(%arg0: i32, %arg1: i32) -> (i32, i32, i32, i32) {
    %c8_i32 = arith.constant 8 : i32
    %0 = arith.muli %c8_i32, %arg0 : i32
    %c1_i32 = arith.constant 1 : i32
    %1 = arith.subi %0, %c1_i32 : i32
    %c0_i32 = arith.constant 0 : i32
    %2 = arith.maxsi %1, %c0_i32 : i32
    %c0_i32_0 = arith.constant 0 : i32
    %c0_i32_1 = arith.constant 0 : i32
    %c0_i32_2 = arith.constant 0 : i32
    return %arg1, %2, %c0_i32_0, %c0_i32_1 : i32, i32, i32, i32
  }
  func.func @transform_2(%arg0: i32, %arg1: i32) -> (i32, i32, i32) {
    %c0_i32 = arith.constant 0 : i32
    %c0_i32_0 = arith.constant 0 : i32
    %c0_i32_1 = arith.constant 0 : i32
    %c0_i32_2 = arith.constant 0 : i32
    return %c0_i32, %c0_i32_0, %c0_i32_1 : i32, i32, i32
  }
  func.func @transform_3(%arg0: i32, %arg1: i32) -> (i32, i32, i32) {
    %c0_i32 = arith.constant 0 : i32
    %c0_i32_0 = arith.constant 0 : i32
    %c0_i32_1 = arith.constant 0 : i32
    %c0_i32_2 = arith.constant 0 : i32
    return %c0_i32, %c0_i32_0, %c0_i32_1 : i32, i32, i32
  }
  func.func @transform_4(%arg0: i32, %arg1: i32) -> (i32, i32) {
    %c0_i32 = arith.constant 0 : i32
    %c0_i32_0 = arith.constant 0 : i32
    %c0_i32_1 = arith.constant 0 : i32
    return %c0_i32, %c0_i32_0 : i32, i32
  }
  func.func @transform_5(%arg0: i32, %arg1: i32) -> (i32, i32, i32, i32) {
    %c0_i32 = arith.constant 0 : i32
    %c0_i32_0 = arith.constant 0 : i32
    %c0_i32_1 = arith.constant 0 : i32
    return %arg1, %arg0, %c0_i32, %c0_i32_0 : i32, i32, i32, i32
  }
}

</mosaic_0001>

<bundles_post_ra>
// kernel: downsample_pallas.1
= control target key start
LH: loop header
LB: loop body
LE: loop exit
PB: predicated region body
PF: predicated region fallthrough
CT: control target
= control target key end

     0   :  { %10 = vsyncpa [#allocation3], 0  ;;  %s2446_s0 = inlined_call_operand.vmem [shape: f32[2,16,8,256], index: 0, kind: input, shape index: {}, may-alias: {0,1}]   ;;  %s2447_s1 = inlined_call_operand.vmem [shape: f32[2,16,8,256], index: 1, kind: input, shape index: {}, may-alias: {0,1}]   ;;  %s2448_s2 = inlined_call_operand.vmem [shape: bf16[3,256,128], index: 2, kind: input, shape index: {}]   ;;  %s2449_s3 = inlined_call_operand.vmem [shape: bf16[3,128,128], index: 3, kind: input, shape index: {}]   ;;  %s2450_s4 = inlined_call_operand.vmem [shape: f32[1,128], index: 4, kind: input, shape index: {}]   ;;  %s2451_s5 = inlined_call_operand.hbm [shape: f32[2,8,8,128], index: 5, kind: output, shape index: {}]  }
   0x1   :  { %12 = vsyncpa [#allocation3 + $0x1], 0  ;;  %s2017_s18 = smov 0   ;;  %s2019_s19 = smov 0  }
   0x2   :  { %s2021_s20 = smov 0   ;;  %s2023_s21 = smov 0  }
   0x3   :  { %s2025_s22 = smov 0   ;;  %s2027_s23 = smov 0  }
   0x4   :  { %s2029_s24 = smov 0   ;;  %s2031_s25 = smov 0  }
   0x5 LB: > { %2456 = sst [smem:[#allocation5_spill]] %s1979_s24  ;;  %s1319_s26 = sadd.s32 4294967295, %s1983_s25   ;;  %s1983_s25 = sphi %s2031_s25, %s18_s25   ;;  %s1979_s24 = sphi %s2029_s24, %s2464_s24   ;;  %s1975_s23 = sphi %s2027_s23, %s2469_s23   ;;  %s1971_s22 = sphi %s2025_s22, %s2462_s22   ;;  %s1967_s21 = sphi %s2023_s21, %s2468_s21   ;;  %s1963_s20 = sphi %s2021_s20, %s2467_s20   ;;  %s1959_s19 = sphi %s2019_s19, %s2466_s19   ;;  %s1955_s18 = sphi %s2017_s18, %s2465_s18  }
   0x6   : > { %s1320_s27 = sadd.s32 4294967294, %s1983_s25   ;;  %s27_s28 = sadd.s32 1, %s1975_s23 }
   0x7   : > { %p28_p0 = scmp.ge.s32.totalorder %s27_s28, 2  ;;  %s30_s29 = sadd.s32 1, %s1979_s24 }
   0x8   : > { %p176_p1 = scmp.ne.s32.totalorder %s1963_s20, %s1959_s19  ;;  %p177_p2 = scmp.eq.s32.totalorder %s1319_s26, 3 }
   0x9   : > { %s2471_s28 = smov (%p28_p0, %s27_s28), 0  ;;  %s2473_s29 = smov (!%p28_p0, %s30_s29), %s1979_s24 }
   0xa   : > { %2457 = sst [smem:[#allocation6_spill]] %s2471_s28  ;;  %s161_s30 = ssub.s32 %s1975_s23, %s2471_s28 }
   0xb   : > { %p2068_p3 = por %p177_p2, %p176_p1  ;;  %p32_p4 = scmp.ge.s32.totalorder %s2473_s29, 2 }
   0xc   : > { %p182_p5 = scmp.ne.s32.totalorder %s1959_s19, %s1955_s18  ;;  %p183_p6 = scmp.eq.s32.totalorder %s1320_s27, 3 }
   0xd   : > { %p1327_p7 = scmp.ge.s32.totalorder %s1983_s25, 1  ;;  %s2475_s29 = smov (%p32_p4, %s2473_s29), 0 }
   0xe   : > { %2459 = sst [smem:[#allocation7_spill]] %s2475_s29  ;;  %p2077_p8 = por %p183_p6, %p182_p5 }
   0xf   : > { %p244_p9 = scmp.lt.s32.totalorder %s1983_s25, 5  ;;  %s162_s8 = ssub.s32 %s1979_s24, %s2475_s29 }
  0x10   : > { %s166_s9 = sadd.s32 1, %s1963_s20  ;;  %s163_s10 = sor.u32 %s162_s8, %s161_s30 }
  0x11   : > { %p245_p10 = pnand %p1327_p7, %p244_p9  ;;  %p164_p11 = scmp.eq.s32.totalorder %s163_s10, 0 }
  0x12   : > { %s1329_s26 = sshll.u32 (!%p245_p10), %s1971_s22, 3  ;;  %p291_p12 = scmp.lt.s32.totalorder (!%p245_p10), %s1967_s21, 1 }
  0x13   : > { %s2086_s11 = scalar_select %p164_p11, %s1963_s20, %s166_s9  }
  0x14   : > { %248 = sbr.rel (%p245_p10) target bundleno = 269 (0x10d), region = 40  ;;  %p293_p13 = scmp.lt.s32.totalorder (!%p245_p10), %s1329_s26, 15 }
  0x15   : > { %s2102_s8 = sadd.s32 (!%p245_p10), 4294967295, %s1329_s26  ;;  %p335_p1 = scmp.gt.s32.totalorder (!%p245_p10), %s1971_s22, 0 }
  0x16   : > { %p303_p0 = scmp.gt.s32.totalorder (!%p245_p10), %s2102_s8, 0  ;;  %p1335_p2 = scmp.lt.s32.totalorder (!%p245_p10), %s2102_s8, 15 }
  0x19   : > { %v1758_v0 = vld [vmem:[%s2448_s2 + $0xb8] sm:$0xff]  ;;  %v1757_v4 = vld [vmem:[%s2448_s2 + $0xb0] sm:$0xff]  ;;  %s2111_s14 = scalar_select %p291_p12, %s1967_s21, 1  ;;  %v1756_v8 = vld [vmem:[%s2448_s2 + $0xa8] sm:$0xff]  ;;  %vm1174_vm0 = vcmask 1040384  }
  0x1a   : > { %v1766_v1 = vld [vmem:[%s2448_s2 + $0xf8] sm:$0xff]  ;;  %533 = vmatpush.bf16.msra.mxu0 %v1758_v0  ;;  %v1765_v5 = vld [vmem:[%s2448_s2 + $0xf0] sm:$0xff]  ;;  %s2477_s26 = smov (!%p293_p13, %s1329_s26), 15  ;;  %v1764_v9 = vld [vmem:[%s2448_s2 + $0xe8] sm:$0xff]  ;;  %s2479_s8 = smov (!%p303_p0, %s2102_s8), 0 }
  0x1b   : > { %v1742_v2 = vld [vmem:[%s2448_s2 + $0x38] sm:$0xff]  ;;  %552 = vmatpush.bf16.msra.mxu1 %v1766_v1  ;;  %v1741_v6 = vld [vmem:[%s2448_s2 + $0x30] sm:$0xff]  ;;  %s2453_s30 = sshll.u32 %s2111_s14, 5  ;;  %s1330_s9 = sshll.u32 %s2477_s26, 1  ;;  %v1740_v10 = vld [vmem:[%s2448_s2 + $0x28] sm:$0xff] }
  0x1c   : > { %v1750_v3 = vld [vmem:[%s2448_s2 + $0x78] sm:$0xff]  ;;  %687 = vmatpush.bf16.msra.mxu2 %v1742_v2  ;;  %v1749_v7 = vld [vmem:[%s2448_s2 + $0x70] sm:$0xff]  ;;  %s297_s15 = sadd.s32 %s2453_s30, %s1330_s9  ;;  %v1748_v11 = vld [vmem:[%s2448_s2 + $0x68] sm:$0xff]  ;;  %s2481_s8 = smov (!%p1335_p2, %s2479_s8), 15 }
  0x1d   : > { %706 = vmatpush.bf16.msra.mxu3 %v1750_v3  ;;  %s1332_s10 = sshll.u32 %s297_s15, 3  ;;  %v1755_v12 = vld [vmem:[%s2448_s2 + $0xa0] sm:$0xff]  ;;  %s1340_s29 = sshll.u32 %s2481_s8, 1  ;;  %v1754_v16 = vld [vmem:[%s2448_s2 + $0x98] sm:$0xff]  ;;  %v1753_v21 = vld [vmem:[%s2448_s2 + $0x90] sm:$0xff] }
  0x1e   : > { %534 = vmatpush.bf16.msra.mxu0 %v1757_v4  ;;  %v1763_v13 = vld [vmem:[%s2448_s2 + $0xe0] sm:$0xff]  ;;  %s336_s16 = scalar_select %p335_p1, 1, 0  ;;  %v1762_v17 = vld [vmem:[%s2448_s2 + $0xd8] sm:$0xff]  ;;  %v1761_v22 = vld [vmem:[%s2448_s2 + $0xd0] sm:$0xff] }
  0x1f   : > { %553 = vmatpush.bf16.msra.mxu1 %v1765_v5  ;;  %v1739_v14 = vld [vmem:[%s2448_s2 + $0x20] sm:$0xff]  ;;  %s2159_s26 = scalar_lea.vmem %s2446_s0, %s1332_s10  ;;  %s2461_s15 = sshll.u32 %s2111_s14, 5  ;;  %v1738_v18 = vld [vmem:[%s2448_s2 + $0x18] sm:$0xff]  ;;  %v1737_v23 = vld [vmem:[%s2448_s2 + $0x10] sm:$0xff] }
  0x20   : > { %688 = vmatpush.bf16.msra.mxu2 %v1741_v6  ;;  %v1747_v15 = vld [vmem:[%s2448_s2 + $0x60] sm:$0xff]  ;;  %s337_s30 = scvt.s32.f32 %s336_s16  ;;  %s311_s27 = sadd.s32 %s1340_s29, %s2461_s15  ;;  %v1746_v19 = vld [vmem:[%s2448_s2 + $0x58] sm:$0xff]  ;;  %v320_v27 = vld [vmem:[%s2159_s26 + $0x8] sm:$0xff] }
  0x21   : > { %707 = vmatpush.bf16.msra.mxu3 %v1749_v7  ;;  %s1342_s9 = sshll.u32 %s311_s27, 3  ;;  %v319_v24 = vld [vmem:[%s2159_s26] sm:$0xff]  ;;  %v324_v29 = vld [vmem:[%s2159_s26 + $0x28] sm:$0xff]  ;;  %v1745_v32 = vld [vmem:[%s2448_s2 + $0x50] sm:$0xff]  ;;  %s287_s16 = sand.u32 1, %s1959_s19  }
  0x22   : > { %535 = vmatpush.bf16.msra.mxu0 %v1756_v8  ;;  %v340_v20 = vstv %s337_s30  ;;  %s313_s15 = scalar_lea.vmem %s2447_s1, %s1342_s9  ;;  %v323_v28 = vld [vmem:[%s2159_s26 + $0x20] sm:$0xff]  ;;  %v321_v33 = vld [vmem:[%s2159_s26 + $0x10] sm:$0xff]  ;;  %v322_v34 = vld [vmem:[%s2159_s26 + $0x18] sm:$0xff]  ;;  %v347_v35 = vpack.c.bf16 %v320_v27, %v319_v24  ;;  %s1728_s30 = sshll.u32 %s1971_s22, 2 }
  0x23   : > { %554 = vmatpush.bf16.msra.mxu1 %v1764_v9  ;;  %v338_v25 = vld [vmem:[%s313_s15] sm:$0xff]  ;;  %v339_v26 = vld [vmem:[%s313_s15 + $0x8] sm:$0xff]  ;;  %v348_v36 = vpack.c.bf16 %v324_v29, %v323_v28  ;;  %v2196_v40 = vpack.c.bf16 %v322_v34, %v321_v33  ;;  %v1774_v55 = vld [vmem:[%s2448_s2 + $0x138] sm:$0xff]  ;;  %s1729_s27 = sshll.u32 %s1967_s21, 3  ;;  %s1328_s28 = sshll.u32 %s287_s16, 5 }
  0x24   : > { %689 = vmatpush.bf16.msra.mxu2 %v1740_v10  ;;  %v341_v30 = vmul.f32 %v340_v20, %v338_v25  ;;  %v342_v31 = vmul.f32 %v340_v20, %v339_v26  ;;  %v1752_v37 = vld [vmem:[%s2448_s2 + $0x88] sm:$0xff]  ;;  %v421_v43 = vunpack.c.l.b16 %v347_v35  ;;  %v422_v45 = vunpack.c.h.b16 %v347_v35  ;;  %v1751_v47 = vld [vmem:[%s2448_s2 + $0x80] sm:$0xff]  ;;  %v1782_v56 = vld [vmem:[%s2448_s2 + $0x178] sm:$0xff]  ;;  %s1207_s24 = sadd.s32 %s1729_s27, %s1728_s30  ;;  %s289_s22 = scalar_lea.vmem [#allocation2], %s1328_s28 }
  0x25   : > { %708 = vmatpush.bf16.msra.mxu3 %v1748_v11  ;;  %v1760_v38 = vld [vmem:[%s2448_s2 + $0xc8] sm:$0xff]  ;;  %v423_v44 = vunpack.c.l.b16 %v348_v36  ;;  %v424_v46 = vunpack.c.h.b16 %v348_v36  ;;  %v1759_v48 = vld [vmem:[%s2448_s2 + $0xc0] sm:$0xff]  ;;  %v577_v50 = vunpack.c.l.b16 %v2196_v40  ;;  %v578_v52 = vunpack.c.h.b16 %v2196_v40  ;;  %v1798_v61 = vld [vmem:[%s2449_s3 + $0x78] sm:$0xff]  ;;  %s1730_s21 = sshll.u32 %s1207_s24, 3  ;;  %s1210_s29 = sshll.u32 %s289_s22, 4  ;;  %s1211_s29 = int_to_ptr.vmem [resolvable:$true] %s1210_s29 }
  0x26   : > { %536 = vmatpush.bf16.msra.mxu0 %v1755_v12  ;;  %v343_v39 = vpack.c.bf16 %v342_v31, %v341_v30  ;;  %v1736_v41 = vld [vmem:[%s2448_s2 + $0x8] sm:$0xff]  ;;  %v1735_v53 = vld [vmem:[%s2448_s2] sm:$0xff]  ;;  %v1790_v62 = vld [vmem:[%s2449_s3 + $0x38] sm:$0xff]  ;;  %s1196_s17 = scalar_lea.sflag [#allocation3], %s287_s16  ;;  %s1909_s28 = scalar_lea.hbm %s2451_s5, 128 }
  0x27   : > { %555 = vmatpush.bf16.msra.mxu1 %v1763_v13  ;;  %v1744_v42 = vld [vmem:[%s2448_s2 + $0x48] sm:$0xff]  ;;  %v1743_v54 = vld [vmem:[%s2448_s2 + $0x40] sm:$0xff]  ;;  %v429_v57 = vpack.c.b16 %v423_v44, %v421_v43  ;;  %v2224_v58 = vpack.c.b16 %v424_v46, %v422_v45  ;;  %v1773_v63 = vld [vmem:[%s2448_s2 + $0x130] sm:$0xff] }
  0x28   : > { %690 = vmatpush.bf16.msra.mxu2 %v1739_v14  ;;  %v575_v49 = vunpack.c.l.b16 %v343_v39  ;;  %v576_v51 = vunpack.c.h.b16 %v343_v39  ;;  %v1781_v0 = vld [vmem:[%s2448_s2 + $0x170] sm:$0xff]  ;;  %v327_v3 = vld [vmem:[%s2159_s26 + $0x40] sm:$0xff]  ;;  %v328_v4 = vld [vmem:[%s2159_s26 + $0x48] sm:$0xff] }
  0x29   : > { %709 = vmatpush.bf16.msra.mxu3 %v1747_v15  ;;  %v1797_v1 = vld [vmem:[%s2449_s3 + $0x70] sm:$0xff]  ;;  %v331_v5 = vld [vmem:[%s2159_s26 + $0x60] sm:$0xff]  ;;  %v332_v6 = vld [vmem:[%s2159_s26 + $0x68] sm:$0xff]  ;;  %v349_v13 = vpack.c.bf16 %v328_v4, %v327_v3 }
  0x2a   : > { %537 = vmatpush.bf16.msra.mxu0 %v1754_v16  ;;  %v583_v59 = vpack.c.b16 %v577_v50, %v575_v49  ;;  %v2230_v60 = vpack.c.b16 %v578_v52, %v576_v51  ;;  %v1789_v2 = vld [vmem:[%s2449_s3 + $0x30] sm:$0xff]  ;;  %v326_v8 = vld [vmem:[%s2159_s26 + $0x38] sm:$0xff]  ;;  %v1772_v11 = vld [vmem:[%s2448_s2 + $0x128] sm:$0xff]  ;;  %v350_v14 = vpack.c.bf16 %v332_v6, %v331_v5 }
  0x2b   : > { %556 = vmatpush.bf16.msra.mxu1 %v1762_v17  ;;  %v325_v7 = vld [vmem:[%s2159_s26 + $0x30] sm:$0xff]  ;;  %v330_v10 = vld [vmem:[%s2159_s26 + $0x58] sm:$0xff]  ;;  %v1780_v12 = vld [vmem:[%s2448_s2 + $0x168] sm:$0xff] }
  0x2c   : > { %691 = vmatpush.bf16.msra.mxu2 %v1738_v18  ;;  %v329_v9 = vld [vmem:[%s2159_s26 + $0x50] sm:$0xff]  ;;  %v2266_v15 = vpack.c.bf16 %v326_v8, %v325_v7  ;;  %v1796_v17 = vld [vmem:[%s2449_s3 + $0x68] sm:$0xff]  ;;  %v1779_v20 = vld [vmem:[%s2448_s2 + $0x160] sm:$0xff]  ;;  %v428_v24 = vunpack.c.h.b16 %v350_v14 }
  0x2d   : > { %710 = vmatpush.bf16.msra.mxu3 %v1746_v19  ;;  %v2268_v16 = vpack.c.bf16 %v330_v10, %v329_v9  ;;  %v1788_v18 = vld [vmem:[%s2449_s3 + $0x28] sm:$0xff]  ;;  %v1771_v19 = vld [vmem:[%s2448_s2 + $0x120] sm:$0xff]  ;;  %v1770_v31 = vld [vmem:[%s2448_s2 + $0x118] sm:$0xff] }
  0x2e   : > { %538 = vmatpush.bf16.msra.mxu0 %v1753_v21  ;;  %v425_v21 = vunpack.c.l.b16 %v349_v13  ;;  %v579_v25 = vunpack.c.l.b16 %v2266_v15  ;;  %v580_v27 = vunpack.c.h.b16 %v2266_v15  ;;  %v1795_v29 = vld [vmem:[%s2449_s3 + $0x60] sm:$0xff]  ;;  %v1769_v39 = vld [vmem:[%s2448_s2 + $0x110] sm:$0xff]  ;;  %v1768_v44 = vld [vmem:[%s2448_s2 + $0x108] sm:$0xff] }
  0x2f   : > { %557 = vmatpush.bf16.msra.mxu1 %v1761_v22  ;;  %v427_v22 = vunpack.c.l.b16 %v350_v14  ;;  %v581_v26 = vunpack.c.l.b16 %v2268_v16  ;;  %v582_v28 = vunpack.c.h.b16 %v2268_v16  ;;  %v1787_v30 = vld [vmem:[%s2449_s3 + $0x20] sm:$0xff]  ;;  %v1785_v43 = vld [vmem:[%s2449_s3 + $0x10] sm:$0xff]  ;;  %v1776_v45 = vld [vmem:[%s2448_s2 + $0x148] sm:$0xff] }
  0x30   : > { %692 = vmatpush.bf16.msra.mxu2 %v1737_v23  ;;  %v426_v23 = vunpack.c.h.b16 %v349_v13  ;;  %v1792_v46 = vld [vmem:[%s2449_s3 + $0x48] sm:$0xff]  ;;  %v1775_v49 = vld [vmem:[%s2448_s2 + $0x140] sm:$0xff]  ;;  %v1806_v51 = vld [vmem:[%s2449_s3 + $0xb8] sm:$0xff] }
  0x31   : > { %711 = vmatpush.bf16.msra.mxu3 %v1745_v32  ;;  %v1778_v32 = vld [vmem:[%s2448_s2 + $0x158] sm:$0xff]  ;;  %v431_v33 = vpack.c.b16 %v427_v22, %v425_v21  ;;  %v585_v35 = vpack.c.b16 %v581_v26, %v579_v25  ;;  %v2304_v36 = vpack.c.b16 %v582_v28, %v580_v27  ;;  %v1804_v40 = vld [vmem:[%s2449_s3 + $0xa8] sm:$0xff]  ;;  %v1799_v3 = vld [vmem:[%s2449_s3 + $0x80] sm:$0xff] }
  0x32   : > { %539 = vmatpush.bf16.msra.mxu0 %v1752_v37  ;;  %v2298_v34 = vpack.c.b16 %v428_v24, %v426_v23  ;;  %v1794_v37 = vld [vmem:[%s2449_s3 + $0x58] sm:$0xff] }
  0x33   : > { %558 = vmatpush.bf16.msra.mxu1 %v1760_v38  ;;  %v1786_v38 = vld [vmem:[%s2449_s3 + $0x18] sm:$0xff] }
  0x34   : > { %693 = vmatpush.bf16.msra.mxu2 %v1736_v41  ;;  %v1777_v41 = vld [vmem:[%s2448_s2 + $0x150] sm:$0xff] }
  0x35   : > { %712 = vmatpush.bf16.msra.mxu3 %v1744_v42  ;;  %v1793_v42 = vld [vmem:[%s2449_s3 + $0x50] sm:$0xff] }
  0x36   : > { %540 = vmatpush.bf16.msra.mxu0 %v1751_v47  ;;  %v1784_v47 = vld [vmem:[%s2449_s3 + $0x8] sm:$0xff] }
  0x37   : > { %559 = vmatpush.bf16.msra.mxu1 %v1759_v48  ;;  %v1767_v48 = vld [vmem:[%s2448_s2 + $0x100] sm:$0xff] }
  0x38   : > { %694 = vmatpush.bf16.msra.mxu2 %v1735_v53  ;;  %v1791_v53 = vld [vmem:[%s2449_s3 + $0x40] sm:$0xff] }
  0x39   : > { %713 = vmatpush.bf16.msra.mxu3 %v1743_v54  ;;  %541 = vmatmul.bf16.vlgmr.msra.gmra.mxu0 %v429_v57  ;;  %v1783_v54 = vld [vmem:[%s2449_s3] sm:$0xff]  ;;  %v1805_v57 = vld [vmem:[%s2449_s3 + $0xb0] sm:$0xff] }
  0x3a   : > { %865 = vmatpush.bf16.msrb.mxu0 %v1774_v55  ;;  %560 = vmatmul.bf16.vlgmr.msra.gmra.mxu1 %v2224_v58  ;;  %v761_v55 = vpack.c.b16 %v579_v25, %v577_v50 }
  0x3b   : > { %884 = vmatpush.bf16.msrb.mxu1 %v1782_v56  ;;  %695 = vmatmul.bf16.vlgmr.msra.gmra.mxu2 %v583_v59  ;;  %v762_v56 = vpack.c.b16 %v580_v27, %v578_v52  ;;  %v333_v59 = vld [vmem:[%s2159_s26 + $0x70] sm:$0xff]  ;;  %v1803_v52 = vld [vmem:[%s2449_s3 + $0xa0] sm:$0xff] }
  0x3c   : > { %714 = vmatmul.bf16.vlgmr.msra.gmra.mxu3 %v2230_v60  ;;  %988 = vmatpush.bf16.msrb.mxu2 %v1798_v61  ;;  %v334_v61 = vld [vmem:[%s2159_s26 + $0x78] sm:$0xff]  ;;  %s1209_s26 = scalar_lea.hbm %s2451_s5, %s1730_s21 }
  0x3d   : > { %1055 = vmatpush.bf16.msrb.mxu3 %v1790_v62  ;;  %v351_v50 = vpack.c.bf16 %v334_v61, %v333_v59  ;;  %v1888_v61 = vld [vmem:[%s2450_s4] ss:$0 sm:$0xff]  ;;  %s1212_s13 = sshll.u32 %s1209_s26, 4  ;;  %s1213_s13 = int_to_ptr.hbm [resolvable:$true] %s1212_s13 }
  0x3e   : > { %866 = vmatpush.bf16.msrb.mxu0 %v1773_v63  ;;  %s1903_s15 = sshra.s32 %s1213_s13, 4  ;;  %s1904_s15 = int_to_ptr.hbm [resolvable:$true] %s1903_s15 }
  0x3f   : > { %885 = vmatpush.bf16.msrb.mxu1 %v1781_v0  ;;  %v759_v62 = vunpack.c.l.b16 %v351_v50  ;;  %v760_v63 = vunpack.c.h.b16 %v351_v50  ;;  %s1905_s8 = scalar_lea.hbm %s1904_s15, 32  ;;  %p1910_p7 = scmp.lt.s32.totalorder %s1904_s15, %s2451_s5 }
  0x40   : > { %989 = vmatpush.bf16.msrb.mxu2 %v1797_v1  ;;  %v1801_v1 = vld [vmem:[%s2449_s3 + $0x90] sm:$0xff]  ;;  %p1906_p4 = scmp.ne.s32.totalorder %s1904_s15, %s1905_s8  ;;  %p1911_p9 = scmp.lt.s32.totalorder %s1909_s28, %s1905_s8 }
  0x41   : > { %1056 = vmatpush.bf16.msrb.mxu3 %v1789_v2  ;;  %v764_v0 = vpack.c.b16 %v760_v63, %v582_v28  ;;  %v1800_v2 = vld [vmem:[%s2449_s3 + $0x88] sm:$0xff] }
  0x42   : > { %867 = vmatpush.bf16.msrb.mxu0 %v1772_v11  ;;  %p1907_p5 = pnand %p1906_p4, %p2068_p3  ;;  %p1912_p10 = por %p1911_p9, %p1910_p7 }
  0x43   : > { %886 = vmatpush.bf16.msrb.mxu1 %v1780_v12 }
  0x44   : > { %990 = vmatpush.bf16.msrb.mxu2 %v1796_v17  ;;  %p1908_p6 = pneg %p1907_p5 }
  0x45   : > { %1057 = vmatpush.bf16.msrb.mxu3 %v1788_v18 }
  0x46   : > { %868 = vmatpush.bf16.msrb.mxu0 %v1771_v19  ;;  %p1913_p11 = pnand %p1912_p10, %p1908_p6 }
  0x47   : > { %887 = vmatpush.bf16.msrb.mxu1 %v1779_v20 }
  0x48   : > { %991 = vmatpush.bf16.msrb.mxu2 %v1795_v29 }
  0x49   : > { %1058 = vmatpush.bf16.msrb.mxu3 %v1787_v30  ;;  %546 = vmatmul.bf16.gmra.mxu0 %v431_v33 }
  0x4a   : > { %869 = vmatpush.bf16.msrb.mxu0 %v1770_v31  ;;  %565 = vmatmul.bf16.gmra.mxu1 %v2298_v34 }
  0x4b   : > { %888 = vmatpush.bf16.msrb.mxu1 %v1778_v32  ;;  %700 = vmatmul.bf16.gmra.mxu2 %v585_v35 }
  0x4c   : > { %719 = vmatmul.bf16.gmra.mxu3 %v2304_v36  ;;  %992 = vmatpush.bf16.msrb.mxu2 %v1794_v37 }
  0x4d   : > { %1059 = vmatpush.bf16.msrb.mxu3 %v1786_v38 }
  0x4e   : > { %870 = vmatpush.bf16.msrb.mxu0 %v1769_v39 }
  0x4f   : > { %889 = vmatpush.bf16.msrb.mxu1 %v1777_v41 }
  0x50   : > { %993 = vmatpush.bf16.msrb.mxu2 %v1793_v42 }
  0x51   : > { %1060 = vmatpush.bf16.msrb.mxu3 %v1785_v43 }
  0x52   : > { %871 = vmatpush.bf16.msrb.mxu0 %v1768_v44 }
  0x53   : > { %890 = vmatpush.bf16.msrb.mxu1 %v1776_v45 }
  0x54   : > { %994 = vmatpush.bf16.msrb.mxu2 %v1792_v46 }
  0x55   : > { %1061 = vmatpush.bf16.msrb.mxu3 %v1784_v47 }
  0x56   : > { %872 = vmatpush.bf16.msrb.mxu0 %v1767_v48 }
  0x57   : > { %891 = vmatpush.bf16.msrb.mxu1 %v1775_v49 }
  0x58   : > { %995 = vmatpush.bf16.msrb.mxu2 %v1791_v53 }
  0x59   : > { %1062 = vmatpush.bf16.msrb.mxu3 %v1783_v54  ;;  %873 = vmatmul.bf16.vlgmr.msrb.gmra.mxu0 %v761_v55 }
  0x5a   : > { %1139 = vmatpush.bf16.msra.mxu0 %v1806_v51  ;;  %892 = vmatmul.bf16.vlgmr.msrb.gmra.mxu1 %v762_v56 }
  0x5b   : > { %1807 = vmatpush.bf16.msra.mxu1 %v1806_v51  ;;  %996 = vmatmul.bf16.vlgmr.msrb.gmra.mxu2 %v2224_v58  ;;  %v1802_v58 = vld [vmem:[%s2449_s3 + $0x98] sm:$0xff] }
  0x5c   : > { %1063 = vmatmul.bf16.vlgmr.msrb.gmra.mxu3 %v2230_v60  ;;  %v763_v60 = vpack.c.b16 %v759_v62, %v581_v26 }
  0x5e   : > { %1140 = vmatpush.bf16.msra.mxu0 %v1805_v57 }
  0x5f   : > { %1808 = vmatpush.bf16.msra.mxu1 %v1805_v57 }
  0x62   : > { %1141 = vmatpush.bf16.msra.mxu0 %v1804_v40 }
  0x63   : > { %1809 = vmatpush.bf16.msra.mxu1 %v1804_v40 }
  0x66   : > { %1142 = vmatpush.bf16.msra.mxu0 %v1803_v52 }
  0x67   : > { %1810 = vmatpush.bf16.msra.mxu1 %v1803_v52 }
  0x69   : > { %878 = vmatmul.bf16.gmra.mxu0 %v763_v60 }
  0x6a   : > { %1143 = vmatpush.bf16.msra.mxu0 %v1802_v58  ;;  %897 = vmatmul.bf16.gmra.mxu1 %v764_v0 }
  0x6b   : > { %1811 = vmatpush.bf16.msra.mxu1 %v1802_v58  ;;  %1001 = vmatmul.bf16.gmra.mxu2 %v2298_v34 }
  0x6c   : > { %1068 = vmatmul.bf16.gmra.mxu3 %v2304_v36 }
  0x6e   : > { %1144 = vmatpush.bf16.msra.mxu0 %v1801_v1 }
  0x6f   : > { %1812 = vmatpush.bf16.msra.mxu1 %v1801_v1 }
  0x72   : > { %1145 = vmatpush.bf16.msra.mxu0 %v1800_v2 }
  0x73   : > { %1813 = vmatpush.bf16.msra.mxu1 %v1800_v2 }
  0x76   : > { %1146 = vmatpush.bf16.msra.mxu0 %v1799_v3 }
  0x77   : > { %1814 = vmatpush.bf16.msra.mxu1 %v1799_v3 }
  0x79   : > { %1147 = vmatmul.bf16.vlgmr.msra.gmra.mxu0 %v762_v56 }
  0x7a   : > { %1152 = vmatmul.bf16.vlgmr.msra.gmra.mxu1 %v764_v0 }
  0xb6   : > { %v542_v4 = vpop.f32.mrf.mxu0 }
  0xb7   : > { %v561_v5 = vpop.f32.mrf.mxu1 }
  0xb8   : > { %v562_v34 = vadd.f32 %v561_v5, %v542_v4 }
  0xbe   : > { %v696_v6 = vpop.f32.mrf.mxu2  ;;  %v544_v8 = vpop.f32.mrf.mxu0 }
  0xbf   : > { %v715_v7 = vpop.f32.mrf.mxu3  ;;  %v563_v9 = vpop.f32.mrf.mxu1  ;;  %v697_v37 = vadd.f32 %v696_v6, %v562_v34 }
  0xc0   : > { %v564_v53 = vadd.f32 %v563_v9, %v544_v8 }
  0xc1   : > { %v716_v47 = vadd.f32 %v715_v7, %v697_v37 }
  0xc6   : > { %v698_v10 = vpop.f32.mrf.mxu2  ;;  %v547_v12 = vpop.f32.mrf.mxu0 }
  0xc7   : > { %v2388_v11 = vpop.f32.mrf.mxu3  ;;  %v566_v13 = vpop.f32.mrf.mxu1  ;;  %v699_v52 = vadd.f32 %v698_v10, %v564_v53 }
  0xc8   : > { %v567_v35 = vadd.f32 %v566_v13, %v547_v12 }
  0xc9   : > { %v718_v9 = vadd.f32 %v2388_v11, %v699_v52 }
  0xce   : > { %v701_v14 = vpop.f32.mrf.mxu2  ;;  %v549_v16 = vpop.f32.mrf.mxu0 }
  0xcf   : > { %v720_v15 = vpop.f32.mrf.mxu3  ;;  %v568_v17 = vpop.f32.mrf.mxu1  ;;  %v702_v38 = vadd.f32 %v701_v14, %v567_v35 }
  0xd0   : > { %v569_v54 = vadd.f32 %v568_v17, %v549_v16 }
  0xd1   : > { %v721_v48 = vadd.f32 %v720_v15, %v702_v38 }
  0xd6   : > { %v703_v18 = vpop.f32.mrf.mxu2  ;;  %v874_v20 = vpop.f32.mrf.mxu0 }
  0xd7   : > { %v722_v19 = vpop.f32.mrf.mxu3  ;;  %v893_v21 = vpop.f32.mrf.mxu1  ;;  %v704_v62 = vadd.f32 %v703_v18, %v569_v54 }
  0xd8   : > { %v894_v41 = vadd.f32 %v893_v21, %v874_v20 }
  0xd9   : > { %v723_v12 = vadd.f32 %v722_v19, %v704_v62 }
  0xda   : > { %v903_v55 = vadd.f32 %v894_v41, %v716_v47 }
  0xde   : > { %v997_v22 = vpop.f32.mrf.mxu2  ;;  %v876_v24 = vpop.f32.mrf.mxu0 }
  0xdf   : > { %v1064_v23 = vpop.f32.mrf.mxu3  ;;  %v895_v25 = vpop.f32.mrf.mxu1 }
  0xe0   : > { %v1065_v39 = vadd.f32 %v1064_v23, %v997_v22  ;;  %v896_v1 = vadd.f32 %v895_v25, %v876_v24 }
  0xe2   : > { %v904_v14 = vadd.f32 %v896_v1, %v718_v9 }
  0xe6   : > { %v999_v26 = vpop.f32.mrf.mxu2  ;;  %v879_v28 = vpop.f32.mrf.mxu0 }
  0xe7   : > { %v1066_v27 = vpop.f32.mrf.mxu3  ;;  %v898_v29 = vpop.f32.mrf.mxu1 }
  0xe8   : > { %v899_v42 = vadd.f32 %v898_v29, %v879_v28  ;;  %v1067_v60 = vadd.f32 %v1066_v27, %v999_v26 }
  0xea   : > { %v905_v56 = vadd.f32 %v899_v42, %v721_v48 }
  0xee   : > { %v881_v30 = vpop.f32.mrf.mxu0  ;;  %v1002_v32 = vpop.f32.mrf.mxu2 }
  0xef   : > { %v900_v31 = vpop.f32.mrf.mxu1  ;;  %v1069_v33 = vpop.f32.mrf.mxu3 }
  0xf0   : > { %v1070_v36 = vadd.f32 %v1069_v33, %v1002_v32  ;;  %v901_v2 = vadd.f32 %v900_v31, %v881_v30 }
  0xf2   : > { %v906_v15 = vadd.f32 %v901_v2, %v723_v12 }
  0xf6   : > { %v1148_v43 = vpop.f32.mrf.mxu0  ;;  %v1004_v57 = vpop.f32.mrf.mxu2 }
  0xf7   : > { %v1153_v44 = vpop.f32.mrf.mxu1  ;;  %v1158_v45 = vadd.f32 %v1148_v43, %v1065_v39  ;;  %v1071_v59 = vpop.f32.mrf.mxu3 }
  0xf8   : > { %v1160_v46 = vadd.f32 %v1153_v44, %v1070_v36  ;;  %v1072_v0 = vadd.f32 %v1071_v59, %v1004_v57 }
  0xf9   : > { %v1166_v49 = vrot.slane %v1158_v45, 7 }
  0xfa   : > { %v1168_v51 = vrot.slane %v1160_v46, 7 }
  0xfb   : > { %v1175_v40 = vsel %vm1174_vm0, 0.0, %v1166_v49 }
  0xfc   : > { %v1177_v50 = vsel %vm1174_vm0, 0.0, %v1168_v51  ;;  %v1179_v63 = vadd.f32 %v1175_v40, %v903_v55 }
  0xfd   : > { %v1181_v58 = vadd.f32 %v1177_v50, %v905_v56 }
  0xfe   : > { %v1187_v3 = vadd.f32 %v1888_v61, %v1179_v63  ;;  %v1150_v5 = vpop.f32.mrf.mxu0 }
  0xff   : > { %v1189_v4 = vadd.f32 %v1888_v61, %v1181_v58  ;;  %v1155_v6 = vpop.f32.mrf.mxu1  ;;  %v1159_v7 = vadd.f32 %v1150_v5, %v1067_v60 }
 0x100   : > { %v1161_v8 = vadd.f32 %v1155_v6, %v1072_v0  ;;  %1191 = vst [vmem:[%s289_s22] sm:$0xff] %v1187_v3 }
 0x101   : > { %1193 = vst [vmem:[%s289_s22 + $0x10] sm:$0xff] %v1189_v4  ;;  %v1167_v10 = vrot.slane %v1159_v7, 7 }
 0x102   : > { %v1169_v13 = vrot.slane %v1161_v8, 7 }
 0x103   : > { %v1176_v16 = vsel %vm1174_vm0, 0.0, %v1167_v10 }
 0x104   : > { %v1178_v17 = vsel %vm1174_vm0, 0.0, %v1169_v13  ;;  %v1180_v11 = vadd.f32 %v1176_v16, %v904_v14 }
 0x105   : > { %v1182_v18 = vadd.f32 %v1178_v17, %v906_v15 }
 0x106   : > { %v1188_v19 = vadd.f32 %v1888_v61, %v1180_v11 }
 0x107   : > { %v1190_v20 = vadd.f32 %v1888_v61, %v1182_v18 }
 0x108   : > { %1192 = vst [vmem:[%s289_s22 + $0x8] sm:$0xff] %v1188_v19 }
 0x109   : > { %1194 = vst [vmem:[%s289_s22 + $0x18] sm:$0xff] %v1190_v20 }
 0x10a   : > { %1916 = shalt.err (!%p1913_p11)
}
 0x10b   : > { %s1985_s16 = smov 128   ;;  %s1986_s24 = smov 8  }
 0x10c   : > { %1815 = dma.vmem_to_hbm [thread:$0]  (%p2068_p3), %s1211_s29, 512, %s1213_s13, %s1196_s17, %s1985_s16, %s1985_s16, %s1986_s24  }
 0x10d PF: > { %p1821_p12 = scmp.ge.s32.totalorder %s1983_s25, 2  ;;  %s1227_s21 = sand.u32 1, %s1955_s18  }
 0x10e   : > { %s1228_s22 = scalar_lea.sflag [#allocation3], %s1227_s21 }
 0x10f   : > { %p1818_p13 = pnand %p1821_p12, %p2077_p8 }
 0x111   : > { %p1819_p0 = pneg %p1818_p13 }
 0x113   : > { %1950 = dma.done.wait (%p1819_p0), %s1228_s22, 512  }
 0x114   : > { %1952 = vsyncadd (%p1819_p0), %s1228_s22, 4294966784  ;;  %s18_s25 = sadd.s32 1, %s1983_s25   ;;  %s2462_s22 = sld [smem:[#allocation5_spill]] }
 0x115   : > { %p15_p1 = scmp.ge.s32.totalorder %s18_s25, 6   ;;  %s2463_s6 = sld [smem:[#allocation6_spill]] }
 0x116   : > { %s2464_s24 = sld [smem:[#allocation7_spill]]  ;;  %s2465_s18 = smov %s1959_s19 }
 0x117   : > { %s2466_s19 = smov %s1963_s20  ;;  %s2467_s20 = smov %s2086_s11 }
 0x118   : > { %s2468_s21 = smov %s1975_s23  ;;  %17 = sbr.rel (!%p15_p1) target bundleno = 5 (0x5), region = 82 }
 0x11b   : > { %s2469_s23 = smov %s2463_s6 }
 0x11d   :  { %1234 = vsyncpa [#allocation3], 1 }
 0x11e   :  { %1236 = vsyncpa [#allocation3 + $0x1], 1 }

</bundles_post_ra>
